<compile_context>
chip_gen: v5e
topology: v5e:2x2
jax: 0.10.0
libtpu: 0.0.40
codegen_flags: <defaults>
</compile_context>

<pallas_src>
import functools

import jax
import jax.numpy as jnp
import numpy as np
from jax.experimental import pallas as pl
from jax.experimental.pallas import tpu as pltpu


def _round_up(x, m):
    return (x + m - 1) // m * m


def _round_down(x, m):
    return x // m * m


def _vmem_capacity_bytes():
    """Chip-aware VMEM capacity with a conservative (v7x) fallback."""
    try:
        info = pltpu.get_tpu_info()
        cap = getattr(info, "vmem_capacity_bytes", None)
        if cap:
            return int(cap)
    except Exception:
        pass
    return 64 * 1024 * 1024  # v7x per-TensorCore VMEM — safe lower bound


def linear_conv_kernel(x_ref, w_ref, b_ref, o_ref, *, nb):
    # x_ref: (nb, C_in, TP)   pixels on lanes, channels on sublanes
    # w_ref: (C_out, C_in)    resident
    # b_ref: (C_out, 1)       resident, f32
    # o_ref: (nb, C_out, TP)  lane-dense output tile
    w = w_ref[...]
    b = b_ref[...]
    for i in range(nb):  # nb is a small static constant
        acc = jnp.dot(w, x_ref[i], preferred_element_type=jnp.float32)
        o_ref[i] = (acc + b).astype(o_ref.dtype)


def linear_conv_forward(x, weight, bias):
    """x: (N, C_in, H, W), weight: (C_out, C_in, 1, 1), bias: (C_out,) -> (N, C_out, H, W)."""
    N, C_in, H, W = x.shape
    C_out = weight.shape[0]
    HW = H * W

    # Y^T = W @ X layout: pure reshapes only, NCHW stays NCHW (no transposes).
    x3 = x.reshape(N, C_in, HW)
    w_mat = weight[:, :, 0, 0]                           # (C_out, C_in), dtype preserved
    b_mat = bias.reshape(C_out, 1).astype(jnp.float32)   # (C_out, 1), f32, hoisted cast

    in_bytes = jnp.dtype(x.dtype).itemsize
    w_bytes = jnp.dtype(w_mat.dtype).itemsize
    out_bytes = in_bytes

    # ---- Chip/budget-aware tile sizing (HBM-bandwidth-bound op). ----
    TARGET_STEP_BYTES = 4 << 20                      # ~4 MiB of HBM traffic per grid step
    lane_bytes = C_in * in_bytes + C_out * out_bytes  # bytes moved per pixel column / image
    # Resident operands; conservatively assume the pipeline double-buffers them.
    const_bytes = 2 * (C_out * C_in * w_bytes + C_out * 4)

    vmem_cap = _vmem_capacity_bytes()
    work_budget = int(vmem_cap * 0.4)                # ~25 MiB on v7x, ~51 MiB on v5e/v6e
    tile_budget = max(work_budget - const_bytes, 1 << 20)

    tp_vmem_max = tile_budget // (2 * lane_bytes)    # double-buffered in+out tiles
    tp_cand = max(128, _round_down(min(tp_vmem_max, TARGET_STEP_BYTES // lane_bytes), 128))

    if HW <= tp_cand:
        # Whole pixel axis in one full-extent lane tile (legal for any HW);
        # amortize step overhead by packing images, but keep >=2 grid steps.
        tp = HW
        nb_target = max(1, TARGET_STEP_BYTES // (lane_bytes * tp))
        nb_vmem = max(1, tile_budget // (2 * lane_bytes * tp))
        nb = int(min(N, nb_target, nb_vmem, max(1, N // 2)))
    else:
        tp = tp_cand   # multiple of 128; ragged last tile handled by Pallas
        nb = 1

    # v7x has 2 TensorCores: make sure a "parallel" axis has >=2 steps when
    # there is enough work to split.
    if pl.cdiv(N, nb) * pl.cdiv(HW, tp) < 2 and HW >= 256:
        tp = _round_up(pl.cdiv(HW, 2), 128)

    grid = (pl.cdiv(N, nb), pl.cdiv(HW, tp))

    tile_bytes = 2 * nb * lane_bytes * tp            # double-buffered x + out blocks
    vmem_limit = int(min(max(const_bytes + tile_bytes + (4 << 20), 32 << 20),
                         int(vmem_cap * 0.9)))

    cost = pl.CostEstimate(
        flops=2 * N * HW * C_in * C_out,
        transcendentals=0,
        bytes_accessed=(N * C_in * HW * in_bytes
                        + C_out * C_in * w_bytes
                        + C_out * 4
                        + N * C_out * HW * out_bytes),
    )

    out3 = pl.pallas_call(
        functools.partial(linear_conv_kernel, nb=nb),
        out_shape=jax.ShapeDtypeStruct((N, C_out, HW), x.dtype),
        grid_spec=pltpu.PrefetchScalarGridSpec(
            num_scalar_prefetch=0,
            grid=grid,
            in_specs=[
                # (nb, C_in, tp) tile per (batch-tile, pixel-tile).
                pl.BlockSpec((nb, C_in, tp), lambda n, j: (n, 0, j)),
                # Full weight, resident across the whole grid.
                pl.BlockSpec((C_out, C_in), lambda n, j: (0, 0)),
                # Bias column, resident.
                pl.BlockSpec((C_out, 1), lambda n, j: (0, 0)),
            ],
            out_specs=pl.BlockSpec((nb, C_out, tp), lambda n, j: (n, 0, j)),
        ),
        compiler_params=pltpu.CompilerParams(
            dimension_semantics=("parallel", "parallel"),
            vmem_limit_bytes=vmem_limit),
        cost_estimate=cost,
    )(x3, w_mat, b_mat)

    # Pure reshape — no padding was added, so nothing to slice off.
    return out3.reshape(N, C_out, H, W)


if __name__ == "__main__":
    # Small shapes consistent with the module's forward (1x1 conv weight).
    N, C_in, H, W = 2, 4, 16, 16
    C_out = 8

    key = jax.random.PRNGKey(0)
    kx, kw, kb = jax.random.split(key, 3)
    x = jax.random.normal(kx, (N, C_in, H, W), dtype=jnp.float32)
    weight = jax.random.normal(kw, (C_out, C_in, 1, 1), dtype=jnp.float32)
    bias = jax.random.normal(kb, (C_out,), dtype=jnp.float32)

    y = jax.block_until_ready(linear_conv_forward(x, weight, bias))

    # Pure-JAX reference of the exact PyTorch semantics.
    ref = jnp.einsum("nchw,oc->nohw", x, weight[:, :, 0, 0]) + bias[None, :, None, None]
    assert y.shape == (N, C_out, H, W)
    np.testing.assert_allclose(np.asarray(y), np.asarray(ref), rtol=1e-5, atol=1e-5)

    print("KERNEL_OK")
</pallas_src>

<mosaic_0001>
module attributes {stable_mosaic.version = 11 : i64} {
  func.func @linear_conv_kernel(%arg0: i32, %arg1: i32, %arg2: memref<1x4x256xf32, #tpu.memory_space<vmem>>, %arg3: memref<8x4xf32, #tpu.memory_space<vmem>>, %arg4: memref<8x1xf32, #tpu.memory_space<vmem>>, %arg5: memref<1x8x256xf32, #tpu.memory_space<vmem>>) attributes {dimension_semantics = [#tpu.dimension_semantics<parallel>, #tpu.dimension_semantics<parallel>], iteration_bounds = array<i64: 2, 1>, scalar_prefetch = 0 : i64, scratch_operands = 0 : i64, tpu.core_type = #tpu.core_type<tc>, window_params = [{transform_indices = @transform_0, window_bounds = array<i64: 1, 4, 256>}, {pipeline_mode = #tpu.pipeline_mode<synchronous>, transform_indices = @transform_1, window_bounds = array<i64: 8, 4>}, {pipeline_mode = #tpu.pipeline_mode<synchronous>, transform_indices = @transform_2, window_bounds = array<i64: 8, 1>}, {transform_indices = @transform_3, window_bounds = array<i64: 1, 8, 256>}]} {
    %c0 = arith.constant 0 : index
    %c0_0 = arith.constant 0 : index
    %0 = vector.load %arg3[%c0, %c0_0] : memref<8x4xf32, #tpu.memory_space<vmem>>, vector<8x4xf32>
    %c0_1 = arith.constant 0 : index
    %c0_2 = arith.constant 0 : index
    %1 = vector.load %arg4[%c0_1, %c0_2] : memref<8x1xf32, #tpu.memory_space<vmem>>, vector<8x1xf32>
    %c0_3 = arith.constant 0 : index
    %c0_4 = arith.constant 0 : index
    %c0_5 = arith.constant 0 : index
    %2 = vector.load %arg2[%c0_3, %c0_4, %c0_5] : memref<1x4x256xf32, #tpu.memory_space<vmem>>, vector<1x4x256xf32>
    %3 = vector.shape_cast %2 : vector<1x4x256xf32> to vector<4x256xf32>
    %cst = arith.constant dense<0.000000e+00> : vector<8x256xf32>
    %4 = tpu.matmul %0, %3, %cst {dimension_numbers = #tpu.dot_dimension_numbers<[1], [0], [0], [1], [0, 0, 1, 1], [], []>} : vector<8x4xf32>, vector<4x256xf32>, vector<8x256xf32> -> vector<8x256xf32>
    %5 = vector.broadcast %1 : vector<8x1xf32> to vector<8x256xf32>
    %6 = arith.addf %4, %5 : vector<8x256xf32>
    %c0_6 = arith.constant 0 : index
    %c0_7 = arith.constant 0 : index
    %c0_8 = arith.constant 0 : index
    %7 = vector.load %arg5[%c0_6, %c0_7, %c0_8] : memref<1x8x256xf32, #tpu.memory_space<vmem>>, vector<1x8x256xf32>
    %8 = vector.shape_cast %7 : vector<1x8x256xf32> to vector<8x256xf32>
    %9 = vector.shape_cast %6 : vector<8x256xf32> to vector<1x8x256xf32>
    tpu.vector_store %arg5[%c0_6, %c0_7, %c0_8], %9 {strides = array<i32>} : memref<1x8x256xf32, #tpu.memory_space<vmem>>, vector<1x8x256xf32>,
    return
  }
  func.func @transform_0(%arg0: i32, %arg1: i32) -> (i32, i32, i32) {
    %c0_i32 = arith.constant 0 : i32
    %c0_i32_0 = arith.constant 0 : i32
    return %arg0, %c0_i32, %arg1 : i32, i32, i32
  }
  func.func @transform_1(%arg0: i32, %arg1: i32) -> (i32, i32) {
    %c0_i32 = arith.constant 0 : i32
    %c0_i32_0 = arith.constant 0 : i32
    %c0_i32_1 = arith.constant 0 : i32
    return %c0_i32, %c0_i32_0 : i32, i32
  }
  func.func @transform_2(%arg0: i32, %arg1: i32) -> (i32, i32) {
    %c0_i32 = arith.constant 0 : i32
    %c0_i32_0 = arith.constant 0 : i32
    %c0_i32_1 = arith.constant 0 : i32
    return %c0_i32, %c0_i32_0 : i32, i32
  }
  func.func @transform_3(%arg0: i32, %arg1: i32) -> (i32, i32, i32) {
    %c0_i32 = arith.constant 0 : i32
    %c0_i32_0 = arith.constant 0 : i32
    return %arg0, %c0_i32, %arg1 : i32, i32, i32
  }
}

</mosaic_0001>

<bundles_post_ra>
// kernel: tpu_custom_call.1
= control target key start
LH: loop header
LB: loop body
LE: loop exit
PB: predicated region body
PF: predicated region fallthrough
CT: control target
= control target key end

     0   :  { %8 = vsyncpa [#allocation3], 0  ;;  %s638_s0 = inlined_call_operand.vmem [shape: f32[2,4,256], index: 0, kind: input, shape index: {}]   ;;  %s639_s1 = inlined_call_operand.vmem [shape: f32[8,4], index: 1, kind: input, shape index: {}]   ;;  %s640_s2 = inlined_call_operand.vmem [shape: f32[8,1], index: 2, kind: input, shape index: {}]   ;;  %s641_s3 = inlined_call_operand.hbm [shape: f32[2,8,256], index: 3, kind: output, shape index: {}]  }
   0x1   :  { %10 = vsyncpa [#allocation3 + $0x1], 0  ;;  %s535_s12 = smov 0   ;;  %s537_s13 = smov 0  }
   0x2   :  { %s539_s14 = smov 0   ;;  %s541_s15 = smov 0  }
   0x3   :  { %s543_s16 = smov 0   ;;  %s545_s17 = smov 0  }
   0x4 LB: > { %s358_s18 = sadd.s32 4294967295, %s512_s17   ;;  %s359_s19 = sadd.s32 4294967294, %s512_s17   ;;  %s512_s17 = sphi %s545_s17, %s16_s17   ;;  %s508_s16 = sphi %s543_s16, %s648_s16   ;;  %s504_s15 = sphi %s541_s15, %s647_s15   ;;  %s500_s14 = sphi %s539_s14, %s646_s14   ;;  %s496_s13 = sphi %s537_s13, %s645_s13   ;;  %s492_s12 = sphi %s535_s12, %s644_s12  }
   0x5   : > { %s28_s20 = sadd.s32 1, %s508_s16  ;;  %s107_s21 = sadd.s32 1, %s500_s14 }
   0x6   : > { %p30_p0 = scmp.ge.s32.totalorder %s28_s20, 2  ;;  %p117_p1 = scmp.ne.s32.totalorder %s500_s14, %s496_s13 }
   0x7   : > { %p118_p2 = scmp.eq.s32.totalorder %s358_s18, 1  ;;  %p123_p3 = scmp.ne.s32.totalorder %s496_s13, %s492_s12 }
   0x8   : > { %s650_s20 = smov (%p30_p0, %s28_s20), 0  ;;  %p124_p5 = scmp.eq.s32.totalorder %s359_s19, 1 }
   0x9   : > { %p575_p4 = por %p118_p2, %p117_p1  ;;  %s102_s23 = ssub.s32 %s508_s16, %s650_s20 }
   0xa   : > { %p362_p6 = scmp.ge.s32.totalorder %s512_s17, 1  ;;  %p105_p7 = scmp.eq.s32.totalorder %s102_s23, 0 }
   0xb   : > { %p582_p8 = por %p124_p5, %p123_p3  ;;  %p161_p9 = scmp.lt.s32.totalorder %s512_s17, 3 }
   0xc   : > { %s588_s25 = scalar_select %p105_p7, %s500_s14, %s107_s21  }
   0xd   : > { %p162_p10 = pnand %p362_p6, %p161_p9 }
   0xe   : > { %p190_p11 = scmp.lt.s32.totalorder (!%p162_p10), %s504_s15, 1  ;;  %s186_s8 = sand.u32 (!%p162_p10), 1, %s496_s13  }
   0xf   : > { %165 = sbr.rel (%p162_p10) target bundleno = 166 (0xa6), region = 32  ;;  %s363_s9 = sshll.u32 (!%p162_p10), %s186_s8, 4 }
  0x10   : > { %s376_s10 = sshll.u32 (!%p162_p10), %s504_s15, 4  ;;  %s188_s21 = scalar_lea.vmem (!%p162_p10), [#allocation2], %s363_s9 }
  0x11   : > { %s277_s19 = scalar_lea.hbm (!%p162_p10), %s641_s3, %s376_s10  ;;  %s279_s23 = sshll.u32 (!%p162_p10), %s188_s21, 4  ;;  %s280_s23 = int_to_ptr.vmem [resolvable:$true] %s279_s23 }
  0x12   : > { %s281_s26 = sshll.u32 (!%p162_p10), %s277_s19, 4  ;;  %s264_s27 = scalar_lea.sflag (!%p162_p10), [#allocation3], %s186_s8  ;;  %s282_s26 = int_to_ptr.hbm [resolvable:$true] %s281_s26 }
  0x13   : > { %s454_s4 = scalar_lea.hbm (!%p162_p10), %s641_s3, 32 }
  0x14   : > { %v201_v0 = vld [vmem:[%s640_s2] sm:$0xff]  ;;  %v514_v1 = vmov 0   ;;  %s191_s28 = scalar_select %p190_p11, %s504_s15, 1  ;;  %vm216_vm0 = vcmask 1043456   ;;  %vm212_vm1 = vcmask 31744  }
  0x15   : > { %433 = vset.pattern.permute.xlu0 %v514_v1  ;;  %v200_v3 = vld [vmem:[%s639_s1] sm:$0xff] }
  0x16   : > { %205 = vperm.xlu0 %433, %v201_v0   ;;  %s375_s29 = sshll.u32 %s191_s28, 3  ;;  %s448_s28 = sshra.s32 %s282_s26, 4  ;;  %s449_s28 = int_to_ptr.hbm [resolvable:$true] %s448_s28 }
  0x17   : > { %s197_s5 = scalar_lea.vmem %s638_s0, %s375_s29  ;;  %s450_s15 = scalar_lea.hbm %s449_s28, 16 }
  0x18   : > { %v202_v2 = vld [vmem:[%s197_s5] sm:$0xff]  ;;  %p451_p12 = scmp.ne.s32.totalorder %s449_s28, %s450_s15  ;;  %p455_p1 = scmp.lt.s32.totalorder %s449_s28, %s641_s3 }
  0x19   : > { %209 = vst [vmem:[#allocation1] ss:$2 sm:$0xff] %v202_v2  ;;  %p456_p2 = scmp.lt.s32.totalorder %s454_s4, %s450_s15 }
  0x1a   : > { %p452_p13 = pnand %p451_p12, %p575_p4 }
  0x1b   : > { %p457_p3 = por %p456_p2, %p455_p1 }
  0x1c   : > { %p453_p0 = pneg %p452_p13 }
  0x1e   : > { %p458_p5 = pnand %p457_p3, %p453_p0 }
  0x20   : > { %v210_v4 = vld.sshfl [vmem:[#allocation1] sm:$0xff pattern:$0x75316420]  ;;  %v211_v5 = vld.sshfl [vmem:[#allocation1 + $0x8] sm:$0xff pattern:$0x75316420] }
  0x21   : > { %366 = vmatpush.msk.msra.mxu0 %vm216_vm0, %v210_v4  ;;  %368 = vmatpush.msk.msra.mxu1 %vm216_vm0, %v211_v5 }
  0x22   : > { %367 = vmatmul.msk.f32.vlgmr.msra.gmra.mxu0 %vm212_vm1, %v200_v3  ;;  %369 = vmatmul.msk.f32.vlgmr.msra.gmra.mxu1 %vm212_vm1, %v200_v3 }
  0x88   : > { %v206_v6 = vpop.permute.xlu0 %205 }
  0x9f   : > { %v238_v7 = vpop.f32.mrf.mxu0  ;;  %v258_v8 = vpop.f32.mrf.mxu1 }
  0xa0   : > { %v239_v9 = vadd.f32 %v238_v7, %v206_v6  ;;  %v259_v10 = vadd.f32 %v258_v8, %v206_v6 }
  0xa2   : > { %261 = vst [vmem:[%s188_s21] sm:$0xff] %v239_v9 }
  0xa3   : > { %262 = vst [vmem:[%s188_s21 + $0x8] sm:$0xff] %v259_v10 }
  0xa4   : > { %461 = shalt.err (!%p458_p5)
}
  0xa5   : > { %377 = dma.vmem_to_hbm [thread:$0]  (%p575_p4), %s280_s23, 256, %s282_s26, %s264_s27  }
  0xa6 PF: > { %p383_p6 = scmp.ge.s32.totalorder %s512_s17, 2  ;;  %s293_s7 = sand.u32 1, %s492_s12  }
  0xa7   : > { %s294_s8 = scalar_lea.sflag [#allocation3], %s293_s7 }
  0xa8   : > { %p380_p7 = pnand %p383_p6, %p582_p8 }
  0xaa   : > { %p381_p9 = pneg %p380_p7 }
  0xac   : > { %487 = dma.done.wait (%p381_p9), %s294_s8, 256  }
  0xad   : > { %489 = vsyncadd (%p381_p9), %s294_s8, 4294967040  ;;  %s16_s17 = sadd.s32 1, %s512_s17   ;;  %s644_s12 = smov %s496_s13 }
  0xae   : > { %p13_p10 = scmp.ge.s32.totalorder %s16_s17, 4   ;;  %s645_s13 = smov %s500_s14 }
  0xaf   : > { %s646_s14 = smov %s588_s25  ;;  %s647_s15 = smov %s508_s16 }
  0xb0   : > { %s648_s16 = smov %s650_s20  ;;  %15 = sbr.rel (!%p13_p10) target bundleno = 4 (0x4), region = 67 }
  0xb5   :  { %300 = vsyncpa [#allocation3], 1 }
  0xb6   :  { %302 = vsyncpa [#allocation3 + $0x1], 1 }

</bundles_post_ra>
